<compile_context>
chip_gen: v6e
topology: v6e:2x2x1
jax: 0.10.0
libtpu: 0.0.40
codegen_flags: <defaults>
</compile_context>

<pallas_src>
import functools

import jax
import jax.numpy as jnp
from jax import lax
from jax.experimental import pallas as pl
from jax.experimental.pallas import tpu as pltpu


def adaptive_norm_kernel(x_ref, w_ref, b_ref, o_ref, *, eps):
    # ---- LayerNorm statistics over the feature (lane) axis, in f32 ---------
    x = x_ref[...].astype(jnp.float32)                        # [TM, D]
    mean = jnp.mean(x, axis=-1, keepdims=True)                # [TM, 1]
    centered = x - mean
    var = jnp.mean(centered * centered, axis=-1, keepdims=True)
    xhat = centered * lax.rsqrt(var + eps)                    # rsqrt -> EUP slot

    # ---- Linear level (affine already folded into W'/b'): bf16 MXU matmul,
    #      f32 accumulation + bias ------------------------------------------
    y = jnp.dot(xhat.astype(jnp.bfloat16), w_ref[...],
                preferred_element_type=jnp.float32) + b_ref[...]
    o_ref[...] = y.astype(o_ref.dtype)


def _fold_affine(gamma, beta, w, b):
    """Fold LayerNorm's affine (gamma, beta) into the Linear (W, b).

    Returns (W' bf16 [D, D_OUT], b' f32 [1, D_OUT]) such that
        (xhat * gamma + beta) @ W + b == xhat @ W' + b'   (up to bf16 rounding)
    """
    d, d_out = w.shape
    w_f32 = w.astype(jnp.float32)
    w_folded = (gamma.reshape(d, 1).astype(jnp.float32) * w_f32).astype(jnp.bfloat16)
    b_folded = (jnp.dot(beta.reshape(1, d).astype(jnp.float32), w_f32,
                        preferred_element_type=jnp.float32)
                + b.reshape(1, d_out).astype(jnp.float32))
    return w_folded, b_folded


def adaptive_normalization_forward(x, gamma, beta, w, b, *, eps=1e-5, tm=256):
    """Fused LayerNorm -> Linear.

    x:     [B, D]       bf16 preferred (any float dtype accepted; cast to bf16)
    gamma: [D]           f32  (LayerNorm weight)
    beta:  [D]           f32  (LayerNorm bias)
    w:     [D, D_OUT]    any float; folded with gamma and cast to bf16
    b:     [D_OUT]       f32  (Linear bias)
    returns [B, D_OUT]   bf16
    """
    batch, d = x.shape
    d_out = w.shape[1]
    if batch % tm != 0:
        raise ValueError(f"batch ({batch}) must be a multiple of tm ({tm}); "
                         "ragged last tiles are not supported.")

    x_bf16 = x.astype(jnp.bfloat16)
    w_folded, b_folded = _fold_affine(gamma, beta, w, b)

    grid = (pl.cdiv(batch, tm),)

    # Only raise the scoped-VMEM limit when the working set actually needs it
    # (v5e default is 16 MiB; v6e/v7x default 32 MiB).
    bytes_needed = (2 * tm * d * 2          # x tile, bf16, double-buffered
                    + 2 * tm * d_out * 2    # out tile, bf16, double-buffered
                    + d * d_out * 2         # resident W' (bf16)
                    + d_out * 4)            # resident b' (f32)
    vmem_limit = None
    if bytes_needed > 12 * 1024 * 1024:
        vmem_limit = min(int(bytes_needed * 3 // 2), 64 * 1024 * 1024)

    kernel = functools.partial(adaptive_norm_kernel, eps=eps)
    return pl.pallas_call(
        kernel,
        out_shape=jax.ShapeDtypeStruct((batch, d_out), jnp.bfloat16),
        grid=grid,
        in_specs=[
            pl.BlockSpec((tm, d), lambda i: (i, 0)),        # x  : tiled over batch
            pl.BlockSpec((d, d_out), lambda i: (0, 0)),     # W' : VMEM-resident
            pl.BlockSpec((1, d_out), lambda i: (0, 0)),     # b' : VMEM-resident
        ],
        out_specs=pl.BlockSpec((tm, d_out), lambda i: (i, 0)),
        compiler_params=pltpu.CompilerParams(
            dimension_semantics=("parallel",),
            vmem_limit_bytes=vmem_limit),
    )(x_bf16, w_folded, b_folded)


if __name__ == "__main__":
    # D = model_class.output_size; lane-dense (multiple of 128).
    # BATCH / TM = 4 parallel grid steps -> both v7x TensorCores get >= 2
    # steps each, so the double-buffer still hides DMA.
    BATCH, D = 1024, 128
    TM = 256
    EPS = 1e-5

    key = jax.random.PRNGKey(0)
    kx, kg, kb, kw, kbi = jax.random.split(key, 5)

    # x generated directly in bf16 (streamed dtype); params in f32.
    x = jax.random.normal(kx, (BATCH, D), dtype=jnp.float32).astype(jnp.bfloat16)
    gamma = 1.0 + 0.1 * jax.random.normal(kg, (D,), dtype=jnp.float32)
    beta = 0.01 * jax.random.normal(kb, (D,), dtype=jnp.float32)
    w = 0.1 * jax.random.normal(kw, (D, D), dtype=jnp.float32)
    b = 0.01 * jax.random.normal(kbi, (D,), dtype=jnp.float32)

    out = adaptive_normalization_forward(x, gamma, beta, w, b, eps=EPS, tm=TM)
    out = jax.block_until_ready(out)
    assert out.shape == (BATCH, D)
    assert out.dtype == jnp.bfloat16

    # ---- Reference 1: identical numerics to the kernel (fold + bf16 points)
    xf = x.astype(jnp.float32)
    mean = jnp.mean(xf, axis=-1, keepdims=True)
    cen = xf - mean
    var = jnp.mean(cen * cen, axis=-1, keepdims=True)
    xhat = cen * lax.rsqrt(var + EPS)
    w_folded, b_folded = _fold_affine(gamma, beta, w, b)
    ref_exact = (jnp.dot(xhat.astype(jnp.bfloat16), w_folded,
                         preferred_element_type=jnp.float32) + b_folded)
    assert jnp.allclose(out.astype(jnp.float32), ref_exact, atol=1e-2, rtol=1e-2), \
        "mismatch vs exact-numerics reference"

    # ---- Reference 2: unfused PyTorch-style f32 LayerNorm -> Linear --------
    xn = cen * lax.rsqrt(var + EPS) * gamma.reshape(1, D) + beta.reshape(1, D)
    ref_sem = jnp.dot(xn, w, preferred_element_type=jnp.float32) + b.reshape(1, D)
    assert jnp.allclose(out.astype(jnp.float32), ref_sem, atol=6e-2, rtol=6e-2), \
        "mismatch vs module-semantics (f32) reference"

    print("KERNEL_OK")
</pallas_src>

<mosaic_0001>
module attributes {stable_mosaic.version = 11 : i64} {
  func.func @adaptive_norm_kernel(%arg0: i32, %arg1: memref<256x128xbf16, #tpu.memory_space<vmem>>, %arg2: memref<128x128xbf16, #tpu.memory_space<vmem>>, %arg3: memref<1x128xf32, #tpu.memory_space<vmem>>, %arg4: memref<256x128xbf16, #tpu.memory_space<vmem>>) attributes {dimension_semantics = [#tpu.dimension_semantics<parallel>], iteration_bounds = array<i64: 4>, scalar_prefetch = 0 : i64, scratch_operands = 0 : i64, tpu.core_type = #tpu.core_type<tc>, window_params = [{transform_indices = @transform_0, window_bounds = array<i64: 256, 128>}, {pipeline_mode = #tpu.pipeline_mode<synchronous>, transform_indices = @transform_1, window_bounds = array<i64: 128, 128>}, {pipeline_mode = #tpu.pipeline_mode<synchronous>, transform_indices = @transform_2, window_bounds = array<i64: 1, 128>}, {transform_indices = @transform_3, window_bounds = array<i64: 256, 128>}]} {
    %c0 = arith.constant 0 : index
    %c0_0 = arith.constant 0 : index
    %0 = vector.load %arg1[%c0, %c0_0] : memref<256x128xbf16, #tpu.memory_space<vmem>>, vector<256x128xbf16>
    %1 = arith.extf %0 : vector<256x128xbf16> to vector<256x128xf32>
    %cst = arith.constant dense<0.000000e+00> : vector<256xf32>
    %2 = vector.multi_reduction <add>, %1, %cst [1] : vector<256x128xf32> to vector<256xf32>
    %3 = vector.shape_cast %2 : vector<256xf32> to vector<256x1xf32>
    %cst_1 = arith.constant 1.280000e+02 : f32
    %4 = vector.broadcast %cst_1 : f32 to vector<256x1xf32>
    %5 = arith.divf %3, %4 : vector<256x1xf32>
    %6 = vector.broadcast %5 : vector<256x1xf32> to vector<256x128xf32>
    %7 = arith.subf %1, %6 : vector<256x128xf32>
    %8 = arith.mulf %7, %7 : vector<256x128xf32>
    %cst_2 = arith.constant dense<0.000000e+00> : vector<256xf32>
    %9 = vector.multi_reduction <add>, %8, %cst_2 [1] : vector<256x128xf32> to vector<256xf32>
    %10 = vector.shape_cast %9 : vector<256xf32> to vector<256x1xf32>
    %cst_3 = arith.constant 1.280000e+02 : f32
    %11 = vector.broadcast %cst_3 : f32 to vector<256x1xf32>
    %12 = arith.divf %10, %11 : vector<256x1xf32>
    %cst_4 = arith.constant 9.99999974E-6 : f32
    %13 = vector.broadcast %cst_4 : f32 to vector<256x1xf32>
    %14 = arith.addf %12, %13 : vector<256x1xf32>
    %15 = math.rsqrt %14 : vector<256x1xf32>
    %16 = vector.broadcast %15 : vector<256x1xf32> to vector<256x128xf32>
    %17 = arith.mulf %7, %16 : vector<256x128xf32>
    %18 = arith.truncf %17 : vector<256x128xf32> to vector<256x128xbf16>
    %c0_5 = arith.constant 0 : index
    %c0_6 = arith.constant 0 : index
    %19 = vector.load %arg2[%c0_5, %c0_6] : memref<128x128xbf16, #tpu.memory_space<vmem>>, vector<128x128xbf16>
    %cst_7 = arith.constant dense<0.000000e+00> : vector<256x128xf32>
    %20 = tpu.matmul %18, %19, %cst_7 {dimension_numbers = #tpu.dot_dimension_numbers<[1], [0], [0], [1], [0, 0, 1, 1], [], []>} : vector<256x128xbf16>, vector<128x128xbf16>, vector<256x128xf32> -> vector<256x128xf32>
    %c0_8 = arith.constant 0 : index
    %c0_9 = arith.constant 0 : index
    %21 = vector.load %arg3[%c0_8, %c0_9] : memref<1x128xf32, #tpu.memory_space<vmem>>, vector<1x128xf32>
    %22 = vector.broadcast %21 : vector<1x128xf32> to vector<256x128xf32>
    %23 = arith.addf %20, %22 : vector<256x128xf32>
    %24 = arith.truncf %23 : vector<256x128xf32> to vector<256x128xbf16>
    %c0_10 = arith.constant 0 : index
    %c0_11 = arith.constant 0 : index
    %25 = vector.load %arg4[%c0_10, %c0_11] : memref<256x128xbf16, #tpu.memory_space<vmem>>, vector<256x128xbf16>
    tpu.vector_store %arg4[%c0_10, %c0_11], %24 {strides = array<i32>} : memref<256x128xbf16, #tpu.memory_space<vmem>>, vector<256x128xbf16>,
    return
  }
  func.func @transform_0(%arg0: i32) -> (i32, i32) {
    %c0_i32 = arith.constant 0 : i32
    %c0_i32_0 = arith.constant 0 : i32
    return %arg0, %c0_i32 : i32, i32
  }
  func.func @transform_1(%arg0: i32) -> (i32, i32) {
    %c0_i32 = arith.constant 0 : i32
    %c0_i32_0 = arith.constant 0 : i32
    %c0_i32_1 = arith.constant 0 : i32
    return %c0_i32, %c0_i32_0 : i32, i32
  }
  func.func @transform_2(%arg0: i32) -> (i32, i32) {
    %c0_i32 = arith.constant 0 : i32
    %c0_i32_0 = arith.constant 0 : i32
    %c0_i32_1 = arith.constant 0 : i32
    return %c0_i32, %c0_i32_0 : i32, i32
  }
  func.func @transform_3(%arg0: i32) -> (i32, i32) {
    %c0_i32 = arith.constant 0 : i32
    %c0_i32_0 = arith.constant 0 : i32
    return %arg0, %c0_i32 : i32, i32
  }
}

</mosaic_0001>

<bundles_post_ra>
// kernel: tpu_custom_call.1
= control target key start
LH: loop header
LB: loop body
LE: loop exit
PB: predicated region body
PF: predicated region fallthrough
CT: control target
= control target key end

     0   :  { %8 = vsyncpa [#allocation3], 0  ;;  %s2377_s0 = inlined_call_operand.hbm [shape: bf16[1024,128], index: 0, kind: input, shape index: {}]   ;;  %s2378_s1 = inlined_call_operand.hbm [shape: bf16[128,128], index: 1, kind: input, shape index: {}]   ;;  %s2379_s2 = inlined_call_operand.vmem [shape: f32[1,128], index: 2, kind: input, shape index: {}]   ;;  %s2380_s3 = inlined_call_operand.hbm [shape: bf16[1024,128], index: 3, kind: output, shape index: {}]  }
   0x1   :  { %10 = vsyncpa [#allocation3 + $0x1], 0 }
   0x2   :  { %11 = vsyncpa [#allocation6], 0 }
   0x3   :  { %12 = vsyncpa [#allocation4], 0 }
   0x4   :  { %14 = vsyncpa [#allocation4 + $0x1], 0  ;;  %s1766_s12 = smov 0   ;;  %s1768_s13 = smov 0  }
   0x5   :  { %s1770_s14 = smov 0   ;;  %s1772_s15 = smov 0  }
   0x6 LB: > { %s1787_s16 = sadd.s32 4294967295, %s1737_s15   ;;  %s1129_s17 = sadd.s32 4294967294, %s1737_s15   ;;  %s1737_s15 = sphi %s1772_s15, %s2401_s15   ;;  %s1733_s14 = sphi %s1770_s14, %s2400_s14   ;;  %s1729_s13 = sphi %s1768_s13, %s2399_s13   ;;  %s1725_s12 = sphi %s1766_s12, %s2398_s12  }
   0x7   : > { %p40_p0 = scmp.ne.s32.totalorder %s1729_s13, %s1725_s12  ;;  %p2381_p1 = scmp.eq.s32.totalorder %s1787_s16, 0 }
   0x8   : > { %p112_p3 = scmp.eq.s32.totalorder %s1129_s17, 3  ;;  %p1130_p5 = scmp.ge.s32.totalorder %s1737_s15, 1 }
   0x9   : > { %p1796_p4 = por %p2381_p1, %p40_p0  ;;  %p119_p7 = scmp.lt.s32.totalorder %s1737_s15, 5 }
   0xa   : > { %p1801_p6 = por %p112_p3, %p40_p0  ;;  %s1739_s21 = smov [#allocation5]  }
   0xb   : > { %s2385_s18 = scalar_select %p1796_p4, 1, 0 }
   0xc   : > { %s2386_s19 = scalar_select %p1801_p6, 1, 0 }
   0xd   : > { %p1806_p8 = pnand %p1130_p5, %p119_p7  ;;  %s131_s22 = sshll.u32 %s1739_s21, 4  ;;  %s132_s22 = int_to_ptr.vmem [resolvable:$true] %s131_s22 }
   0xe   : > { %s1819_s24 = sadd.s32 1, %s1737_s15   ;;  %s27_s25 = sadd.s32 1, %s1733_s14 }
   0xf   : > { %s2387_s20 = scalar_select %p1806_p8, 1, 0 }
  0x10   : > { %p1490_p9 = pneg %p1806_p8  ;;  %s24_s26 = ssub.s32 %s1737_s15, %s1819_s24 }
  0x11   : > { %s1626_s27 = scalar_lea.vmem %s132_s22, 1024  ;;  %p1634_p3 = scmp.lt.s32.totalorder %s132_s22, %s132_s22 }
  0x12   : > { %p1814_p10 = pnand %p1490_p9, %p2381_p1  ;;  %p1627_p12 = scmp.ne.s32.totalorder %s132_s22, %s1626_s27 }
  0x13   : > { %p1635_p5 = scmp.lt.s32.totalorder %s1626_s27, %s1626_s27 }
  0x14   : > { %p1617_p11 = pneg %p1814_p10 }
  0x15   : > { %p1636_p7 = por %p1635_p5, %p1634_p3 }
  0x16   : > { %p1629_p13 = pnand %p1627_p12, %p1617_p11 }
  0x18   : > { %p1630_p0 = pneg %p1629_p13 }
  0x1a   : > { %p1637_p2 = pnand %p1636_p7, %p1630_p0 }
  0x1c   : > { %1640 = shalt.err (!%p1637_p2)
}
  0x1d   : > { %s1740_s28 = smov 64   ;;  %s1741_s29 = smov 4  }
  0x1e   : > { %1493 = dma.hbm_to_vmem [thread:$0]  (!%p1814_p10), %s2378_s1, 1024, %s132_s22, [#allocation6], %s1740_s28, %s1740_s28, %s1741_s29  }
  0x1f   : > { %p25_p2 = scmp.eq.s32.totalorder %s24_s26, 0  ;;  %p34_p9 = scmp.ne.s32.totalorder %s1733_s14, %s1729_s13 }
  0x20   : > { %p35_p11 = scmp.eq.s32.totalorder %s1737_s15, 0  ;;  %p1503_p12 = scmp.lt.s32.totalorder %s1737_s15, 4 }
  0x21   : > { %s1839_s5 = scalar_select %p25_p2, %s1733_s14, %s27_s25  }
  0x22   : > { %p36_p13 = por %p35_p11, %p34_p9  ;;  %p2389_p0 = scmp.eq.s32.totalorder %s1787_s16, 3 }
  0x23   : > { %s148_s7 = sand.u32 1, %s1733_s14   ;;  %s1186_s8 = sshll.u32 %s1737_s15, 11 }
  0x24   : > { %p1843_p3 = por %p2389_p0, %p34_p9  ;;  %s1133_s9 = sshll.u32 %s148_s7, 7 }
  0x25   : > { %s1852_s17 = scalar_lea.hbm %s2377_s0, %s1186_s8  ;;  %s152_s21 = scalar_lea.vmem [#allocation2], %s1133_s9 }
  0x26   : > { %s2390_s6 = scalar_select %p1843_p3, 1, 0 }
  0x27   : > { %s159_s22 = sshll.u32 %s152_s21, 4  ;;  %p1854_p10 = pnand %p1503_p12, %p36_p13  ;;  %s1858_s22 = int_to_ptr.vmem [resolvable:$true] %s159_s22 }
  0x28   : > { %s1860_s25 = scalar_lea.sflag [#allocation3], %s148_s7  ;;  %s1641_s26 = scalar_lea.hbm %s1852_s17, 2048 }
  0x29   : > { %p1642_p5 = scmp.ne.s32.totalorder %s1852_s17, %s1641_s26  ;;  %p1643_p7 = pneg %p1854_p10 }
  0x2a   : > { %s1646_s4 = scalar_lea.hbm %s2377_s0, 8192  ;;  %p1647_p11 = scmp.lt.s32.totalorder %s1852_s17, %s2377_s0 }
  0x2b   : > { %p1644_p2 = pnand %p1643_p7, %p1642_p5  ;;  %p1648_p12 = scmp.lt.s32.totalorder %s1646_s4, %s1641_s26 }
  0x2d   : > { %p1645_p9 = pneg %p1644_p2  ;;  %p1649_p13 = por %p1648_p12, %p1647_p11 }
  0x2f   : > { %p1650_p0 = pnand %p1649_p13, %p1645_p9 }
  0x31   : > { %1653 = shalt.err (!%p1650_p0)
}
  0x32   : > { %s1654_s7 = scalar_lea.vmem %s1858_s22, 2048  ;;  %s1742_s10 = smov [#allocation2]  }
  0x33   : > { %p1655_p1 = scmp.ne.s32.totalorder %s1858_s22, %s1654_s7  ;;  %s1659_s11 = sshll.u32 %s1742_s10, 4  ;;  %s1660_s11 = int_to_ptr.vmem [resolvable:$false] %s1659_s11 }
  0x34   : > { %s1661_s21 = scalar_lea.vmem %s1660_s11, 4096  ;;  %p1662_p2 = scmp.lt.s32.totalorder %s1858_s22, %s1660_s11 }
  0x35   : > { %p1657_p6 = pnand %p1655_p1, %p1643_p7  ;;  %p1663_p3 = scmp.lt.s32.totalorder %s1661_s21, %s1654_s7 }
  0x37   : > { %p1658_p5 = pneg %p1657_p6  ;;  %p1664_p4 = por %p1663_p3, %p1662_p2 }
  0x39   : > { %p1665_p8 = pnand %p1664_p4, %p1658_p5 }
  0x3b   : > { %1668 = shalt.err (!%p1665_p8)
}
  0x3c   : > { %1497 = dma.hbm_to_vmem [thread:$0]  (!%p1854_p10), %s1852_s17, 2048, %s1858_s22, %s1860_s25, %s1740_s28, %s1740_s28, %s1741_s29  }
  0x3d   : > { %p2392_p1 = scmp.ne.s32.totalorder %s2387_s20, 0 }
  0x3e   : > { %s1887_s26 = sand.u32 (!%p2392_p1), 1, %s1729_s13   ;;  %p2393_p4 = scmp.ne.s32.totalorder (!%p2392_p1), %s2385_s18, 0 }
  0x3f   : > { %171 = sbr.rel (%p2392_p1) target bundleno = 660 (0x294), region = 32  ;;  %s1137_s27 = sshll.u32 (!%p2392_p1), %s1887_s26, 7 }
  0x40   : > { %s174_s30 = scalar_lea.sflag (!%p2392_p1), [#allocation3], %s1887_s26  ;;  %s1893_s23 = scalar_lea.vmem (!%p2392_p1), [#allocation2], %s1137_s27 }
  0x44   : > { %1712 = dma.done.wait (%p2393_p4), %s174_s30, 2048  }
  0x45   : > { %1714 = vsyncadd (%p2393_p4), %s174_s30, 4294965248  ;;  %p2394_p6 = scmp.eq.s32.totalorder %s1787_s16, 0 }
  0x47   : > { %1716 = dma.done.wait (%p2394_p6), [#allocation6], 1024   ;;  %p2395_p8 = pmov %p2394_p6 }
  0x48   : > { %v1904_v0 = vld [vmem:[%s1893_s23] sm:$0xff]   ;;  %v1918_v6 = vld [vmem:[%s1893_s23 + $0x8] sm:$0xff]   ;;  %v1936_v12 = vld [vmem:[%s1893_s23 + $0x10] sm:$0xff]   ;;  %s2282_s28 = scalar_lea.vmem [#allocation7], %s1137_s27  ;;  %s1219_s29 = sshll.u32 %s1787_s16, 11 }
  0x49   : > { %1718 = vsyncadd (%p2395_p8), [#allocation6], 4294966272  ;;  %v1907_v1 = vld [vmem:[%s1893_s23 + $0x40] sm:$0xff]   ;;  %v1222_v2 = vunpack.c.l.bf16 %v1904_v0  ;;  %v1223_v4 = vunpack.c.h.bf16 %v1904_v0  ;;  %v1921_v7 = vld [vmem:[%s1893_s23 + $0x48] sm:$0xff]   ;;  %v1226_v8 = vunpack.c.l.bf16 %v1918_v6  ;;  %v1227_v9 = vunpack.c.h.bf16 %v1918_v6  ;;  %s1046_s17 = sshll.u32 %s2282_s28, 4  ;;  %s2331_s4 = scalar_lea.hbm %s2380_s3, %s1219_s29  ;;  %s2333_s17 = int_to_ptr.vmem [resolvable:$true] %s1046_s17 }
  0x4a   : > { %v1254_v3 = vunpack.c.l.bf16 %v1907_v1  ;;  %v1255_v5 = vunpack.c.h.bf16 %v1907_v1  ;;  %v1258_v10 = vunpack.c.l.bf16 %v1921_v7  ;;  %v1259_v11 = vunpack.c.h.bf16 %v1921_v7  ;;  %v1945_v15 = vld [vmem:[%s1893_s23 + $0x50] sm:$0xff]   ;;  %v1954_v18 = vld [vmem:[%s1893_s23 + $0x18] sm:$0xff]   ;;  %v1972_v24 = vld [vmem:[%s1893_s23 + $0x20] sm:$0xff]   ;;  %s1033_s16 = scalar_lea.sflag [#allocation4], %s1887_s26  ;;  %s1669_s8 = scalar_lea.vmem %s2333_s17, 2048 }
  0x4b   : > { %271 = vadd.xlane.f32.xlu0 %v1222_v2  ;;  %v1230_v13 = vunpack.c.l.bf16 %v1936_v12  ;;  %v1231_v14 = vunpack.c.h.bf16 %v1936_v12  ;;  %v1262_v16 = vunpack.c.l.bf16 %v1945_v15  ;;  %v1263_v17 = vunpack.c.h.bf16 %v1945_v15  ;;  %v1963_v21 = vld [vmem:[%s1893_s23 + $0x58] sm:$0xff]   ;;  %v1981_v27 = vld [vmem:[%s1893_s23 + $0x60] sm:$0xff]   ;;  %v1990_v30 = vld [vmem:[%s1893_s23 + $0x28] sm:$0xff]   ;;  %p1670_p3 = scmp.ne.s32.totalorder %s2333_s17, %s1669_s8  ;;  %p2396_p10 = scmp.ne.s32.totalorder %s2390_s6, 0 }
  0x4c   : > { %303 = vadd.xlane.f32.xlu1 %v1254_v3  ;;  %v1234_v19 = vunpack.c.l.bf16 %v1954_v18  ;;  %v1235_v20 = vunpack.c.h.bf16 %v1954_v18  ;;  %v1266_v22 = vunpack.c.l.bf16 %v1963_v21  ;;  %v1267_v23 = vunpack.c.h.bf16 %v1963_v21  ;;  %v1999_v33 = vld [vmem:[%s1893_s23 + $0x68] sm:$0xff]   ;;  %v2008_v36 = vld [vmem:[%s1893_s23 + $0x30] sm:$0xff]   ;;  %v2026_v42 = vld [vmem:[%s1893_s23 + $0x38] sm:$0xff]   ;;  %s1743_s9 = smov [#allocation7]  }
  0x4d   : > { %v1238_v25 = vunpack.c.l.bf16 %v1972_v24  ;;  %v1239_v26 = vunpack.c.h.bf16 %v1972_v24  ;;  %v1270_v28 = vunpack.c.l.bf16 %v1981_v27  ;;  %v1271_v29 = vunpack.c.h.bf16 %v1981_v27  ;;  %v2017_v39 = vld [vmem:[%s1893_s23 + $0x70] sm:$0xff]   ;;  %v2035_v45 = vld [vmem:[%s1893_s23 + $0x78] sm:$0xff]   ;;  %p1671_p7 = pnand %p1670_p3, %p2396_p10  ;;  %s1673_s7 = sshll.u32 %s1743_s9, 4  ;;  %s1674_s7 = int_to_ptr.vmem [resolvable:$false] %s1673_s7 }
  0x4e   : > { %v1242_v31 = vunpack.c.l.bf16 %v1990_v30  ;;  %v1243_v32 = vunpack.c.h.bf16 %v1990_v30  ;;  %v1274_v34 = vunpack.c.l.bf16 %v1999_v33  ;;  %v1275_v35 = vunpack.c.h.bf16 %v1999_v33  ;;  %s1675_s10 = scalar_lea.vmem %s1674_s7, 4096  ;;  %p1676_p11 = scmp.lt.s32.totalorder %s2333_s17, %s1674_s7 }
  0x4f   : > { %273 = vadd.xlane.f32.xlu0 %v1223_v4  ;;  %v1246_v37 = vunpack.c.l.bf16 %v2008_v36  ;;  %v1247_v38 = vunpack.c.h.bf16 %v2008_v36  ;;  %v1278_v40 = vunpack.c.l.bf16 %v2017_v39  ;;  %v1279_v41 = vunpack.c.h.bf16 %v2017_v39  ;;  %p1672_p9 = pneg %p1671_p7  ;;  %p1677_p12 = scmp.lt.s32.totalorder %s1675_s10, %s1669_s8 }
  0x50   : > { %305 = vadd.xlane.f32.xlu1 %v1255_v5  ;;  %v1250_v43 = vunpack.c.l.bf16 %v2026_v42  ;;  %v1251_v44 = vunpack.c.h.bf16 %v2026_v42  ;;  %v1282_v46 = vunpack.c.l.bf16 %v2035_v45  ;;  %v1283_v47 = vunpack.c.h.bf16 %v2035_v45 }
  0x51   : > { %p1678_p13 = por %p1677_p12, %p1676_p11 }
  0x53   : > { %275 = vadd.xlane.f32.xlu0 %v1226_v8  ;;  %p1679_p0 = pnand %p1678_p13, %p1672_p9 }
  0x54   : > { %277 = vadd.xlane.f32.xlu1 %v1227_v9 }
  0x57   : > { %307 = vadd.xlane.f32.xlu0 %v1258_v10 }
  0x58   : > { %309 = vadd.xlane.f32.xlu1 %v1259_v11 }
  0x5b   : > { %279 = vadd.xlane.f32.xlu0 %v1230_v13 }
  0x5c   : > { %281 = vadd.xlane.f32.xlu1 %v1231_v14 }
  0x5f   : > { %311 = vadd.xlane.f32.xlu0 %v1262_v16 }
  0x60   : > { %313 = vadd.xlane.f32.xlu1 %v1263_v17 }
  0x63   : > { %283 = vadd.xlane.f32.xlu0 %v1234_v19 }
  0x64   : > { %285 = vadd.xlane.f32.xlu1 %v1235_v20 }
  0x67   : > { %315 = vadd.xlane.f32.xlu0 %v1266_v22 }
  0x68   : > { %317 = vadd.xlane.f32.xlu1 %v1267_v23 }
  0x6b   : > { %287 = vadd.xlane.f32.xlu0 %v1238_v25 }
  0x6c   : > { %289 = vadd.xlane.f32.xlu1 %v1239_v26 }
  0x6f   : > { %319 = vadd.xlane.f32.xlu0 %v1270_v28 }
  0x70   : > { %321 = vadd.xlane.f32.xlu1 %v1271_v29 }
  0x73   : > { %291 = vadd.xlane.f32.xlu0 %v1242_v31 }
  0x74   : > { %293 = vadd.xlane.f32.xlu1 %v1243_v32 }
  0x77   : > { %323 = vadd.xlane.f32.xlu0 %v1274_v34 }
  0x78   : > { %325 = vadd.xlane.f32.xlu1 %v1275_v35 }
  0x7b   : > { %295 = vadd.xlane.f32.xlu0 %v1246_v37 }
  0x7c   : > { %297 = vadd.xlane.f32.xlu1 %v1247_v38 }
  0x7f   : > { %327 = vadd.xlane.f32.xlu0 %v1278_v40 }
  0x80   : > { %329 = vadd.xlane.f32.xlu1 %v1279_v41 }
  0x83   : > { %299 = vadd.xlane.f32.xlu0 %v1250_v43 }
  0x84   : > { %301 = vadd.xlane.f32.xlu1 %v1251_v44 }
  0x87   : > { %331 = vadd.xlane.f32.xlu0 %v1282_v46 }
  0x88   : > { %333 = vadd.xlane.f32.xlu1 %v1283_v47 }
  0xd4   : > { %v272_v48 = vpop.xlane.xlu0 %271 }
  0xd5   : > { %v304_v49 = vpop.xlane.xlu1 %303  ;;  %v336_v50 = vmul.f32 0.0078125, %v272_v48 }
  0xd6   : > { %v352_v51 = vmul.f32 0.0078125, %v304_v49 }
  0xd7   : > { %v2049_v52 = vsub.f32 %v1222_v2, %v336_v50 }
  0xd8   : > { %v2053_v53 = vsub.f32 %v1254_v3, %v352_v51  ;;  %v274_v54 = vpop.xlane.xlu0 %273 }
  0xd9   : > { %v306_v55 = vpop.xlane.xlu1 %305  ;;  %v337_v56 = vmul.f32 0.0078125, %v274_v54  ;;  %v400_v57 = vmul.f32 %v2049_v52, %v2049_v52 }
  0xda   : > { %v353_v58 = vmul.f32 0.0078125, %v306_v55  ;;  %v416_v61 = vmul.f32 %v2053_v53, %v2053_v53 }
  0xdb   : > { %v2059_v59 = vsub.f32 %v1223_v4, %v337_v56  ;;  %432 = vadd.xlane.f32.xlu0 %v400_v57 }
  0xdc   : > { %v2063_v60 = vsub.f32 %v1255_v5, %v353_v58  ;;  %v276_v62 = vpop.xlane.xlu0 %275 }
  0xdd   : > { %v278_v63 = vpop.xlane.xlu1 %277  ;;  %v338_v2 = vmul.f32 0.0078125, %v276_v62  ;;  %v401_v3 = vmul.f32 %v2059_v59, %v2059_v59  ;;  %v1543_v62 = vld [vmem:[#allocation5 + $0x38] sm:$0xff]  }
  0xde   : > { %v339_v48 = vmul.f32 0.0078125, %v278_v63  ;;  %v417_v4 = vmul.f32 %v2063_v60, %v2063_v60  ;;  %1418 = vmatprep.subr.bf16.mxu0 %v1543_v62  ;;  %1466 = vmatprep.subr.bf16.mxu1 %v1543_v62 }
  0xdf   : > { %v2071_v0 = vsub.f32 %v1226_v8, %v338_v2  ;;  %464 = vadd.xlane.f32.xlu0 %v416_v61  ;;  %434 = vadd.xlane.f32.xlu1 %v401_v3 }
  0xe0   : > { %v2075_v1 = vsub.f32 %v1227_v9, %v339_v48  ;;  %v308_v5 = vpop.xlane.xlu0 %307  ;;  %1419 = vmatpush3.bf16.msra.mxu0 %v1543_v62  ;;  %1474 = vmatpush3.bf16.msra.mxu1 %v1543_v62 }
  0xe1   : > { %v310_v49 = vpop.xlane.xlu1 %309  ;;  %v354_v50 = vmul.f32 0.0078125, %v308_v5  ;;  %v402_v51 = vmul.f32 %v2071_v0, %v2071_v0 }
  0xe2   : > { %v355_v54 = vmul.f32 0.0078125, %v310_v49  ;;  %v403_v9 = vmul.f32 %v2075_v1, %v2075_v1 }
  0xe3   : > { %v2083_v8 = vsub.f32 %v1258_v10, %v354_v50  ;;  %466 = vadd.xlane.f32.xlu1 %v417_v4  ;;  %436 = vadd.xlane.f32.xlu0 %v402_v51 }
  0xe4   : > { %v2087_v6 = vsub.f32 %v1259_v11, %v355_v54  ;;  %v280_v55 = vpop.xlane.xlu0 %279 }
  0xe5   : > { %v282_v56 = vpop.xlane.xlu1 %281  ;;  %v340_v57 = vmul.f32 0.0078125, %v280_v55  ;;  %v418_v58 = vmul.f32 %v2083_v8, %v2083_v8 }
  0xe6   : > { %v341_v61 = vmul.f32 0.0078125, %v282_v56  ;;  %v419_v11 = vmul.f32 %v2087_v6, %v2087_v6 }
  0xe7   : > { %v2095_v10 = vsub.f32 %v1230_v13, %v340_v57  ;;  %438 = vadd.xlane.f32.xlu1 %v403_v9  ;;  %468 = vadd.xlane.f32.xlu0 %v418_v58  ;;  %v1544_v13 = vld [vmem:[#allocation5 + $0x30] sm:$0xff]  }
  0xe8   : > { %v2099_v7 = vsub.f32 %v1231_v14, %v341_v61  ;;  %v312_v63 = vpop.xlane.xlu0 %311  ;;  %1420 = vmatprep.subr.bf16.mxu0 %v1544_v13  ;;  %1467 = vmatprep.subr.bf16.mxu1 %v1544_v13 }
  0xe9   : > { %v314_v2 = vpop.xlane.xlu1 %313  ;;  %v356_v3 = vmul.f32 0.0078125, %v312_v63  ;;  %v404_v48 = vmul.f32 %v2095_v10, %v2095_v10  ;;  %1421 = vmatpush3.bf16.msra.mxu0 %v1544_v13  ;;  %1475 = vmatpush3.bf16.msra.mxu1 %v1544_v13 }
  0xea   : > { %v357_v4 = vmul.f32 0.0078125, %v314_v2  ;;  %v405_v5 = vmul.f32 %v2099_v7, %v2099_v7 }
  0xeb   : > { %v2107_v12 = vsub.f32 %v1262_v16, %v356_v3  ;;  %470 = vadd.xlane.f32.xlu1 %v419_v11  ;;  %440 = vadd.xlane.f32.xlu0 %v404_v48  ;;  %v1545_v16 = vld [vmem:[#allocation5 + $0x28] sm:$0xff]  }
  0xec   : > { %v2111_v14 = vsub.f32 %v1263_v17, %v357_v4  ;;  %v284_v49 = vpop.xlane.xlu0 %283  ;;  %1422 = vmatprep.subr.bf16.mxu0 %v1545_v16  ;;  %1468 = vmatprep.subr.bf16.mxu1 %v1545_v16 }
  0xed   : > { %v286_v50 = vpop.xlane.xlu1 %285  ;;  %v342_v51 = vmul.f32 0.0078125, %v284_v49  ;;  %v420_v54 = vmul.f32 %v2107_v12, %v2107_v12  ;;  %1423 = vmatpush3.bf16.msra.mxu0 %v1545_v16  ;;  %1476 = vmatpush3.bf16.msra.mxu1 %v1545_v16 }
  0xee   : > { %v343_v9 = vmul.f32 0.0078125, %v286_v50  ;;  %v421_v55 = vmul.f32 %v2111_v14, %v2111_v14 }
  0xef   : > { %v2119_v15 = vsub.f32 %v1234_v19, %v342_v51  ;;  %442 = vadd.xlane.f32.xlu1 %v405_v5  ;;  %472 = vadd.xlane.f32.xlu0 %v420_v54  ;;  %v1546_v19 = vld [vmem:[#allocation5 + $0x20] sm:$0xff]  }
  0xf0   : > { %v2123_v17 = vsub.f32 %v1235_v20, %v343_v9  ;;  %v316_v56 = vpop.xlane.xlu0 %315  ;;  %1424 = vmatprep.subr.bf16.mxu0 %v1546_v19  ;;  %1469 = vmatprep.subr.bf16.mxu1 %v1546_v19 }
  0xf1   : > { %v318_v57 = vpop.xlane.xlu1 %317  ;;  %v358_v58 = vmul.f32 0.0078125, %v316_v56  ;;  %v406_v61 = vmul.f32 %v2119_v15, %v2119_v15  ;;  %1425 = vmatpush3.bf16.msra.mxu0 %v1546_v19  ;;  %1477 = vmatpush3.bf16.msra.mxu1 %v1546_v19 }
  0xf2   : > { %v359_v62 = vmul.f32 0.0078125, %v318_v57  ;;  %v407_v11 = vmul.f32 %v2123_v17, %v2123_v17 }
  0xf3   : > { %v2131_v18 = vsub.f32 %v1266_v22, %v358_v58  ;;  %474 = vadd.xlane.f32.xlu1 %v421_v55  ;;  %444 = vadd.xlane.f32.xlu0 %v406_v61  ;;  %v1547_v22 = vld [vmem:[#allocation5 + $0x18] sm:$0xff]  }
  0xf4   : > { %v2135_v20 = vsub.f32 %v1267_v23, %v359_v62  ;;  %v288_v63 = vpop.xlane.xlu0 %287  ;;  %1426 = vmatprep.subr.bf16.mxu0 %v1547_v22  ;;  %1470 = vmatprep.subr.bf16.mxu1 %v1547_v22 }
  0xf5   : > { %v290_v2 = vpop.xlane.xlu1 %289  ;;  %v344_v3 = vmul.f32 0.0078125, %v288_v63  ;;  %v422_v48 = vmul.f32 %v2131_v18, %v2131_v18  ;;  %1427 = vmatpush3.bf16.msra.mxu0 %v1547_v22  ;;  %1478 = vmatpush3.bf16.msra.mxu1 %v1547_v22 }
  0xf6   : > { %v345_v4 = vmul.f32 0.0078125, %v290_v2  ;;  %v423_v13 = vmul.f32 %v2135_v20, %v2135_v20 }
  0xf7   : > { %v2143_v21 = vsub.f32 %v1238_v25, %v344_v3  ;;  %446 = vadd.xlane.f32.xlu1 %v407_v11  ;;  %476 = vadd.xlane.f32.xlu0 %v422_v48  ;;  %v1548_v25 = vld [vmem:[#allocation5 + $0x10] sm:$0xff]  }
  0xf8   : > { %v2147_v23 = vsub.f32 %v1239_v26, %v345_v4  ;;  %v320_v5 = vpop.xlane.xlu0 %319  ;;  %1428 = vmatprep.subr.bf16.mxu0 %v1548_v25  ;;  %1471 = vmatprep.subr.bf16.mxu1 %v1548_v25 }
  0xf9   : > { %v322_v49 = vpop.xlane.xlu1 %321  ;;  %v360_v50 = vmul.f32 0.0078125, %v320_v5  ;;  %v408_v51 = vmul.f32 %v2143_v21, %v2143_v21  ;;  %1429 = vmatpush3.bf16.msra.mxu0 %v1548_v25  ;;  %1479 = vmatpush3.bf16.msra.mxu1 %v1548_v25 }
  0xfa   : > { %v361_v54 = vmul.f32 0.0078125, %v322_v49  ;;  %v409_v9 = vmul.f32 %v2147_v23, %v2147_v23 }
  0xfb   : > { %v2155_v24 = vsub.f32 %v1270_v28, %v360_v50  ;;  %478 = vadd.xlane.f32.xlu1 %v423_v13  ;;  %448 = vadd.xlane.f32.xlu0 %v408_v51  ;;  %v1549_v28 = vld [vmem:[#allocation5 + $0x8] sm:$0xff]  }
  0xfc   : > { %v2159_v26 = vsub.f32 %v1271_v29, %v361_v54  ;;  %v292_v16 = vpop.xlane.xlu0 %291  ;;  %1430 = vmatprep.subr.bf16.mxu0 %v1549_v28  ;;  %1472 = vmatprep.subr.bf16.mxu1 %v1549_v28 }
  0xfd   : > { %v294_v55 = vpop.xlane.xlu1 %293  ;;  %v346_v56 = vmul.f32 0.0078125, %v292_v16  ;;  %v424_v57 = vmul.f32 %v2155_v24, %v2155_v24  ;;  %1431 = vmatpush3.bf16.msra.mxu0 %v1549_v28  ;;  %1480 = vmatpush3.bf16.msra.mxu1 %v1549_v28 }
  0xfe   : > { %v347_v58 = vmul.f32 0.0078125, %v294_v55  ;;  %v425_v61 = vmul.f32 %v2159_v26, %v2159_v26 }
  0xff   : > { %v2167_v27 = vsub.f32 %v1242_v31, %v346_v56  ;;  %450 = vadd.xlane.f32.xlu1 %v409_v9  ;;  %480 = vadd.xlane.f32.xlu0 %v424_v57  ;;  %v1550_v31 = vld [vmem:[#allocation5] sm:$0xff]  }
 0x100   : > { %v2171_v29 = vsub.f32 %v1243_v32, %v347_v58  ;;  %v324_v62 = vpop.xlane.xlu0 %323  ;;  %1432 = vmatprep.subr.bf16.mxu0 %v1550_v31  ;;  %1473 = vmatprep.subr.bf16.mxu1 %v1550_v31 }
 0x101   : > { %v326_v19 = vpop.xlane.xlu1 %325  ;;  %v362_v11 = vmul.f32 0.0078125, %v324_v62  ;;  %v410_v63 = vmul.f32 %v2167_v27, %v2167_v27  ;;  %1433 = vmatpush3.bf16.msra.mxu0 %v1550_v31  ;;  %1481 = vmatpush3.bf16.msra.mxu1 %v1550_v31 }
 0x102   : > { %v363_v2 = vmul.f32 0.0078125, %v326_v19  ;;  %v411_v3 = vmul.f32 %v2171_v29, %v2171_v29 }
 0x103   : > { %v2179_v30 = vsub.f32 %v1274_v34, %v362_v11  ;;  %482 = vadd.xlane.f32.xlu1 %v425_v61  ;;  %452 = vadd.xlane.f32.xlu0 %v410_v63 }
 0x104   : > { %v2183_v32 = vsub.f32 %v1275_v35, %v363_v2  ;;  %v296_v48 = vpop.xlane.xlu0 %295 }
 0x105   : > { %v298_v4 = vpop.xlane.xlu1 %297  ;;  %v348_v22 = vmul.f32 0.0078125, %v296_v48  ;;  %v426_v13 = vmul.f32 %v2179_v30, %v2179_v30 }
 0x106   : > { %v349_v5 = vmul.f32 0.0078125, %v298_v4  ;;  %v427_v35 = vmul.f32 %v2183_v32, %v2183_v32 }
 0x107   : > { %v2191_v34 = vsub.f32 %v1246_v37, %v348_v22  ;;  %454 = vadd.xlane.f32.xlu1 %v411_v3  ;;  %484 = vadd.xlane.f32.xlu0 %v426_v13 }
 0x108   : > { %v2195_v33 = vsub.f32 %v1247_v38, %v349_v5  ;;  %v328_v49 = vpop.xlane.xlu0 %327 }
 0x109   : > { %v330_v50 = vpop.xlane.xlu1 %329  ;;  %v364_v51 = vmul.f32 0.0078125, %v328_v49  ;;  %v412_v54 = vmul.f32 %v2191_v34, %v2191_v34 }
 0x10a   : > { %v365_v25 = vmul.f32 0.0078125, %v330_v50  ;;  %v413_v38 = vmul.f32 %v2195_v33, %v2195_v33 }
 0x10b   : > { %v2203_v37 = vsub.f32 %v1278_v40, %v364_v51  ;;  %486 = vadd.xlane.f32.xlu1 %v427_v35  ;;  %456 = vadd.xlane.f32.xlu0 %v412_v54 }
 0x10c   : > { %v2207_v36 = vsub.f32 %v1279_v41, %v365_v25  ;;  %v300_v9 = vpop.xlane.xlu0 %299 }
 0x10d   : > { %v302_v16 = vpop.xlane.xlu1 %301  ;;  %v350_v55 = vmul.f32 0.0078125, %v300_v9  ;;  %v428_v56 = vmul.f32 %v2203_v37, %v2203_v37 }
 0x10e   : > { %v351_v57 = vmul.f32 0.0078125, %v302_v16  ;;  %v429_v41 = vmul.f32 %v2207_v36, %v2207_v36 }
 0x10f   : > { %v2215_v40 = vsub.f32 %v1250_v43, %v350_v55  ;;  %458 = vadd.xlane.f32.xlu1 %v413_v38  ;;  %488 = vadd.xlane.f32.xlu0 %v428_v56 }
 0x110   : > { %v2219_v39 = vsub.f32 %v1251_v44, %v351_v57  ;;  %v332_v58 = vpop.xlane.xlu0 %331 }
 0x111   : > { %v334_v28 = vpop.xlane.xlu1 %333  ;;  %v366_v61 = vmul.f32 0.0078125, %v332_v58  ;;  %v414_v62 = vmul.f32 %v2215_v40, %v2215_v40 }
 0x112   : > { %v367_v19 = vmul.f32 0.0078125, %v334_v28  ;;  %v415_v44 = vmul.f32 %v2219_v39, %v2219_v39 }
 0x113   : > { %v2227_v43 = vsub.f32 %v1282_v46, %v366_v61  ;;  %490 = vadd.xlane.f32.xlu1 %v429_v41  ;;  %460 = vadd.xlane.f32.xlu0 %v414_v62 }
 0x114   : > { %v2231_v42 = vsub.f32 %v1283_v47, %v367_v19 }
 0x115   : > { %v430_v11 = vmul.f32 %v2227_v43, %v2227_v43 }
 0x116   : > { %v431_v63 = vmul.f32 %v2231_v42, %v2231_v42 }
 0x117   : > { %462 = vadd.xlane.f32.xlu1 %v415_v44  ;;  %492 = vadd.xlane.f32.xlu0 %v430_v11 }
 0x11b   : > { %494 = vadd.xlane.f32.xlu1 %v431_v63 }
 0x164   : > { %v433_v46 = vpop.xlane.xlu0 %432 }
 0x165   : > { %v496_v2 = vmul.f32 0.0078125, %v433_v46 }
 0x167   : > { %v528_v31 = vadd.f32 1e-05, %v496_v2 }
 0x168   : > { %v435_v3 = vpop.xlane.xlu1 %434  ;;  %v465_v48 = vpop.xlane.xlu0 %464 }
 0x169   : > { %v497_v45 = vmul.f32 0.0078125, %v435_v3  ;;  %v512_v47 = vmul.f32 0.0078125, %v465_v48  ;;  %1551 = vrsqrt.f32 %v528_v31 }
 0x16b   : > { %v529_v4 = vadd.f32 1e-05, %v497_v45  ;;  %v544_v22 = vadd.f32 1e-05, %v512_v47 }
 0x16c   : > { %v467_v13 = vpop.xlane.xlu1 %466  ;;  %v437_v5 = vpop.xlane.xlu0 %436 }
 0x16d   : > { %1553 = vrsqrt.f32 %v529_v4  ;;  %v513_v35 = vmul.f32 0.0078125, %v467_v13  ;;  %v498_v49 = vmul.f32 0.0078125, %v437_v5 }
 0x16e   : > { %1555 = vrsqrt.f32 %v544_v22 }
 0x16f   : > { %v545_v50 = vadd.f32 1e-05, %v513_v35  ;;  %v530_v51 = vadd.f32 1e-05, %v498_v49 }
 0x170   : > { %v439_v54 = vpop.xlane.xlu1 %438  ;;  %v469_v25 = vpop.xlane.xlu0 %468 }
 0x171   : > { %1557 = vrsqrt.f32 %v545_v50  ;;  %v499_v38 = vmul.f32 0.0078125, %v439_v54  ;;  %v514_v9 = vmul.f32 0.0078125, %v469_v25 }
 0x172   : > { %1559 = vrsqrt.f32 %v530_v51 }
 0x173   : > { %v531_v16 = vadd.f32 1e-05, %v499_v38  ;;  %v546_v55 = vadd.f32 1e-05, %v514_v9 }
 0x174   : > { %v471_v56 = vpop.xlane.xlu1 %470  ;;  %v441_v57 = vpop.xlane.xlu0 %440 }
 0x175   : > { %1561 = vrsqrt.f32 %v531_v16  ;;  %v515_v41 = vmul.f32 0.0078125, %v471_v56  ;;  %v500_v58 = vmul.f32 0.0078125, %v441_v57 }
 0x176   : > { %v1552_v28 = vpop.eup %1551  ;;  %1563 = vrsqrt.f32 %v546_v55 }
 0x177   : > { %v547_v61 = vadd.f32 1e-05, %v515_v41  ;;  %v532_v62 = vadd.f32 1e-05, %v500_v58  ;;  %v592_v2 = vmul.f32 %v1552_v28, %v2049_v52 }
 0x178   : > { %v443_v19 = vpop.xlane.xlu1 %442  ;;  %v473_v44 = vpop.xlane.xlu0 %472 }
 0x179   : > { %1565 = vrsqrt.f32 %v547_v61  ;;  %v501_v11 = vmul.f32 0.0078125, %v443_v19  ;;  %v516_v63 = vmul.f32 0.0078125, %v473_v44 }
 0x17a   : > { %v1554_v46 = vpop.eup %1553  ;;  %1567 = vrsqrt.f32 %v532_v62 }
 0x17b   : > { %v1556_v31 = vpop.eup %1555  ;;  %v533_v3 = vadd.f32 1e-05, %v501_v11  ;;  %v548_v48 = vadd.f32 1e-05, %v516_v63  ;;  %v593_v45 = vmul.f32 %v1554_v46, %v2059_v59 }
 0x17c   : > { %v475_v47 = vpop.xlane.xlu1 %474  ;;  %v445_v4 = vpop.xlane.xlu0 %444  ;;  %v608_v49 = vmul.f32 %v1556_v31, %v2053_v53 }
 0x17d   : > { %1569 = vrsqrt.f32 %v533_v3  ;;  %v517_v22 = vmul.f32 0.0078125, %v475_v47  ;;  %v502_v13 = vmul.f32 0.0078125, %v445_v4  ;;  %v624_v5 = vpack.c.bf16 %v593_v45, %v592_v2 }
 0x17e   : > { %v1558_v35 = vpop.eup %1557  ;;  %1571 = vrsqrt.f32 %v548_v48 }
 0x17f   : > { %v1560_v50 = vpop.eup %1559  ;;  %v549_v51 = vadd.f32 1e-05, %v517_v22  ;;  %v534_v54 = vadd.f32 1e-05, %v502_v13  ;;  %1434 = vmatprep.mubr.bf16.mxu0 %v624_v5  ;;  %v609_v52 = vmul.f32 %v1558_v35, %v2063_v60 }
 0x180   : > { %v447_v25 = vpop.xlane.xlu1 %446  ;;  %v477_v38 = vpop.xlane.xlu0 %476  ;;  %v594_v56 = vmul.f32 %v1560_v50, %v2071_v0 }
 0x181   : > { %1573 = vrsqrt.f32 %v549_v51  ;;  %v503_v59 = vmul.f32 0.0078125, %v447_v25  ;;  %v518_v9 = vmul.f32 0.0078125, %v477_v38  ;;  %v632_v16 = vpack.c.bf16 %v609_v52, %v608_v49 }
 0x182   : > { %v1562_v55 = vpop.eup %1561  ;;  %1575 = vrsqrt.f32 %v534_v54 }
 0x183   : > { %v535_v57 = vadd.f32 1e-05, %v503_v59  ;;  %v550_v41 = vadd.f32 1e-05, %v518_v9  ;;  %1450 = vmatprep.mubr.bf16.mxu1 %v632_v16  ;;  %v595_v53 = vmul.f32 %v1562_v55, %v2075_v1  ;;  %v1564_v58 = vpop.eup %1563 }
 0x184   : > { %v479_v28 = vpop.xlane.xlu1 %478  ;;  %v449_v61 = vpop.xlane.xlu0 %448  ;;  %v610_v0 = vmul.f32 %v1564_v58, %v2083_v8 }
 0x185   : > { %1577 = vrsqrt.f32 %v535_v57  ;;  %v519_v60 = vmul.f32 0.0078125, %v479_v28  ;;  %v504_v62 = vmul.f32 0.0078125, %v449_v61  ;;  %v625_v19 = vpack.c.bf16 %v595_v53, %v594_v56 }
 0x186   : > { %v1566_v44 = vpop.eup %1565  ;;  %1579 = vrsqrt.f32 %v550_v41 }
 0x187   : > { %v551_v11 = vadd.f32 1e-05, %v519_v60  ;;  %v536_v63 = vadd.f32 1e-05, %v504_v62  ;;  %1435 = vmatmul.mubr.bf16.vlgmr.msra.gmra.mxu0 %v625_v19  ;;  %v611_v46 = vmul.f32 %v1566_v44, %v2087_v6  ;;  %v1568_v2 = vpop.eup %1567 }
 0x188   : > { %v451_v31 = vpop.xlane.xlu1 %450  ;;  %v481_v3 = vpop.xlane.xlu0 %480  ;;  %v596_v13 = vmul.f32 %v1568_v2, %v2095_v10 }
 0x189   : > { %1581 = vrsqrt.f32 %v551_v11  ;;  %v505_v1 = vmul.f32 0.0078125, %v451_v31  ;;  %v520_v48 = vmul.f32 0.0078125, %v481_v3  ;;  %v633_v45 = vpack.c.bf16 %v611_v46, %v610_v0 }
 0x18a   : > { %v1570_v47 = vpop.eup %1569  ;;  %1583 = vrsqrt.f32 %v536_v63 }
 0x18b   : > { %v537_v4 = vadd.f32 1e-05, %v505_v1  ;;  %v552_v22 = vadd.f32 1e-05, %v520_v48  ;;  %1451 = vmatmul.mubr.bf16.vlgmr.msra.gmra.mxu1 %v633_v45  ;;  %v597_v5 = vmul.f32 %v1570_v47, %v2099_v7  ;;  %v1572_v35 = vpop.eup %1571 }
 0x18c   : > { %v483_v8 = vpop.xlane.xlu1 %482  ;;  %v453_v49 = vpop.xlane.xlu0 %452  ;;  %v612_v38 = vmul.f32 %v1572_v35, %v2107_v12 }
 0x18d   : > { %1585 = vrsqrt.f32 %v537_v4  ;;  %v521_v6 = vmul.f32 0.0078125, %v483_v8  ;;  %v506_v50 = vmul.f32 0.0078125, %v453_v49  ;;  %v626_v51 = vpack.c.bf16 %v597_v5, %v596_v13 }
 0x18e   : > { %v1574_v54 = vpop.eup %1573  ;;  %1587 = vrsqrt.f32 %v552_v22 }
 0x18f   : > { %v553_v52 = vadd.f32 1e-05, %v521_v6  ;;  %v538_v25 = vadd.f32 1e-05, %v506_v50  ;;  %1438 = vmatprep.mubr.bf16.mxu0 %v626_v51  ;;  %v613_v59 = vmul.f32 %v1574_v54, %v2111_v14  ;;  %v1576_v9 = vpop.eup %1575 }
 0x190   : > { %v455_v10 = vpop.xlane.xlu1 %454  ;;  %v485_v16 = vpop.xlane.xlu0 %484  ;;  %v598_v28 = vmul.f32 %v1576_v9, %v2119_v15 }
 0x191   : > { %1589 = vrsqrt.f32 %v553_v52  ;;  %v507_v7 = vmul.f32 0.0078125, %v455_v10  ;;  %v522_v55 = vmul.f32 0.0078125, %v485_v16  ;;  %v634_v56 = vpack.c.bf16 %v613_v59, %v612_v38 }
 0x192   : > { %v1578_v57 = vpop.eup %1577  ;;  %1591 = vrsqrt.f32 %v538_v25 }
 0x193   : > { %v1580_v41 = vpop.eup %1579  ;;  %v539_v53 = vadd.f32 1e-05, %v507_v7  ;;  %v554_v58 = vadd.f32 1e-05, %v522_v55  ;;  %1454 = vmatprep.mubr.bf16.mxu1 %v634_v56  ;;  %v599_v61 = vmul.f32 %v1578_v57, %v2123_v17 }
 0x194   : > { %v487_v12 = vpop.xlane.xlu1 %486  ;;  %v457_v60 = vpop.xlane.xlu0 %456  ;;  %v614_v11 = vmul.f32 %v1580_v41, %v2131_v18 }
 0x195   : > { %1593 = vrsqrt.f32 %v539_v53  ;;  %v523_v14 = vmul.f32 0.0078125, %v487_v12  ;;  %v508_v62 = vmul.f32 0.0078125, %v457_v60  ;;  %v627_v19 = vpack.c.bf16 %v599_v61, %v598_v28 }
 0x196   : > { %v1582_v44 = vpop.eup %1581  ;;  %1595 = vrsqrt.f32 %v554_v58 }
 0x197   : > { %v1584_v63 = vpop.eup %1583  ;;  %v555_v0 = vadd.f32 1e-05, %v523_v14  ;;  %v540_v46 = vadd.f32 1e-05, %v508_v62  ;;  %1439 = vmatmul.mubr.bf16.gmra.mxu0 %v627_v19  ;;  %v615_v2 = vmul.f32 %v1582_v44, %v2135_v20 }
 0x198   : > { %v459_v31 = vpop.xlane.xlu1 %458  ;;  %v489_v15 = vpop.xlane.xlu0 %488  ;;  %v600_v45 = vmul.f32 %v1584_v63, %v2143_v21 }
 0x199   : > { %1597 = vrsqrt.f32 %v555_v0  ;;  %v509_v17 = vmul.f32 0.0078125, %v459_v31  ;;  %v524_v3 = vmul.f32 0.0078125, %v489_v15  ;;  %v635_v1 = vpack.c.bf16 %v615_v2, %v614_v11 }
 0x19a   : > { %v1586_v48 = vpop.eup %1585  ;;  %1599 = vrsqrt.f32 %v540_v46 }
 0x19b   : > { %v1588_v47 = vpop.eup %1587  ;;  %v541_v4 = vadd.f32 1e-05, %v509_v17  ;;  %v556_v18 = vadd.f32 1e-05, %v524_v3  ;;  %1455 = vmatmul.mubr.bf16.gmra.mxu1 %v635_v1  ;;  %v601_v22 = vmul.f32 %v1586_v48, %v2147_v23  ;;  %v2274_v17 = vld [vmem:[%s2379_s2] ss:$0 sm:$0xff] }
 0x19c   : > { %v491_v13 = vpop.xlane.xlu1 %490  ;;  %v461_v5 = vpop.xlane.xlu0 %460  ;;  %v616_v6 = vmul.f32 %v1588_v47, %v2155_v24 }
 0x19d   : > { %1601 = vrsqrt.f32 %v541_v4  ;;  %v525_v20 = vmul.f32 0.0078125, %v491_v13  ;;  %v510_v35 = vmul.f32 0.0078125, %v461_v5  ;;  %v628_v8 = vpack.c.bf16 %v601_v22, %v600_v45 }
 0x19e   : > { %v1590_v49 = vpop.eup %1589  ;;  %1603 = vrsqrt.f32 %v556_v18 }
 0x19f   : > { %v1592_v50 = vpop.eup %1591  ;;  %v557_v51 = vadd.f32 1e-05, %v525_v20  ;;  %v542_v21 = vadd.f32 1e-05, %v510_v35  ;;  %1442 = vmatprep.mubr.bf16.mxu0 %v628_v8  ;;  %v617_v54 = vmul.f32 %v1590_v49, %v2159_v26 }
 0x1a0   : > { %v463_v52 = vpop.xlane.xlu1 %462  ;;  %v493_v25 = vpop.xlane.xlu0 %492  ;;  %v602_v10 = vmul.f32 %v1592_v50, %v2167_v27 }
 0x1a1   : > { %1605 = vrsqrt.f32 %v557_v51  ;;  %v511_v23 = vmul.f32 0.0078125, %v463_v52  ;;  %v526_v38 = vmul.f32 0.0078125, %v493_v25  ;;  %v636_v59 = vpack.c.bf16 %v617_v54, %v616_v6 }
 0x1a2   : > { %v1594_v9 = vpop.eup %1593  ;;  %1607 = vrsqrt.f32 %v542_v21 }
 0x1a3   : > { %v543_v16 = vadd.f32 1e-05, %v511_v23  ;;  %v558_v7 = vadd.f32 1e-05, %v526_v38  ;;  %1458 = vmatprep.mubr.bf16.mxu1 %v636_v59  ;;  %v603_v24 = vmul.f32 %v1594_v9, %v2171_v29  ;;  %v1596_v55 = vpop.eup %1595 }
 0x1a4   : > { %v495_v56 = vpop.xlane.xlu1 %494  ;;  %v618_v58 = vmul.f32 %v1596_v55, %v2179_v30 }
 0x1a5   : > { %1609 = vrsqrt.f32 %v543_v16  ;;  %v527_v57 = vmul.f32 0.0078125, %v495_v56  ;;  %v629_v26 = vpack.c.bf16 %v603_v24, %v602_v10 }
 0x1a6   : > { %v1598_v41 = vpop.eup %1597  ;;  %1611 = vrsqrt.f32 %v558_v7 }
 0x1a7   : > { %v559_v53 = vadd.f32 1e-05, %v527_v57  ;;  %1443 = vmatmul.mubr.bf16.gmra.mxu0 %v629_v26  ;;  %v619_v28 = vmul.f32 %v1598_v41, %v2183_v32  ;;  %v1600_v27 = vpop.eup %1599 }
 0x1a8   : > { %v604_v29 = vmul.f32 %v1600_v27, %v2191_v34 }
 0x1a9   : > { %1613 = vrsqrt.f32 %v559_v53  ;;  %v637_v61 = vpack.c.bf16 %v619_v28, %v618_v58 }
 0x1aa   : > { %v1602_v12 = vpop.eup %1601 }
 0x1ab   : > { %1459 = vmatmul.mubr.bf16.gmra.mxu1 %v637_v61  ;;  %v605_v60 = vmul.f32 %v1602_v12, %v2195_v33  ;;  %v1604_v14 = vpop.eup %1603 }
 0x1ac   : > { %v620_v44 = vmul.f32 %v1604_v14, %v2203_v37 }
 0x1ad   : > { %v630_v62 = vpack.c.bf16 %v605_v60, %v604_v29 }
 0x1ae   : > { %v1606_v19 = vpop.eup %1605 }
 0x1af   : > { %1446 = vmatprep.mubr.bf16.mxu0 %v630_v62  ;;  %v621_v11 = vmul.f32 %v1606_v19, %v2207_v36  ;;  %v1608_v30 = vpop.eup %1607 }
 0x1b0   : > { %v606_v0 = vmul.f32 %v1608_v30, %v2215_v40 }
 0x1b1   : > { %v638_v63 = vpack.c.bf16 %v621_v11, %v620_v44 }
 0x1b2   : > { %v1610_v32 = vpop.eup %1609 }
 0x1b3   : > { %1462 = vmatprep.mubr.bf16.mxu1 %v638_v63  ;;  %v607_v46 = vmul.f32 %v1610_v32, %v2219_v39  ;;  %v1612_v2 = vpop.eup %1611 }
 0x1b4   : > { %v622_v33 = vmul.f32 %v1612_v2, %v2227_v43 }
 0x1b5   : > { %v631_v34 = vpack.c.bf16 %v607_v46, %v606_v0 }
 0x1b6   : > { %v1614_v31 = vpop.eup %1613 }
 0x1b7   : > { %1447 = vmatmul.mubr.bf16.gmra.mxu0 %v631_v34  ;;  %v623_v15 = vmul.f32 %v1614_v31, %v2231_v42 }
 0x1b9   : > { %v639_v37 = vpack.c.bf16 %v623_v15, %v622_v33 }
 0x1bb   : > { %1463 = vmatmul.mubr.bf16.gmra.mxu1 %v639_v37 }
 0x247   : > { %v1436_v36 = vpop.f32.mrf.mxu0 }
 0x248   : > { %v754_v1 = vadd.f32 %v1436_v36, %v2274_v17 }
 0x249   : > { %v745_v40 = vpop.f32.mrf.mxu0 }
 0x24a   : > { %v746_v42 = vadd.f32 %v2274_v17, %v745_v40 }
 0x24b   : > { %v1437_v3 = vpop.f32.mrf.mxu0  ;;  %v1452_v39 = vpop.f32.mrf.mxu1 }
 0x24c   : > { %v757_v48 = vadd.f32 %v1437_v3, %v2274_v17  ;;  %v818_v22 = vadd.f32 %v1452_v39, %v2274_v17 }
 0x24d   : > { %v748_v45 = vpop.f32.mrf.mxu0  ;;  %v809_v43 = vpop.f32.mrf.mxu1 }
 0x24e   : > { %v1292_v47 = vpack.c.bf16 %v757_v48, %v754_v1  ;;  %v749_v4 = vadd.f32 %v2274_v17, %v748_v45  ;;  %v810_v35 = vadd.f32 %v2274_v17, %v809_v43 }
 0x24f   : > { %v1453_v18 = vpop.f32.mrf.mxu1 }
 0x250   : > { %1379 = vst [vmem:[%s2282_s28 + $0x8] sm:$0xff] %v1292_v47   ;;  %v1287_v13 = vpack.c.bf16 %v749_v4, %v746_v42  ;;  %v821_v5 = vadd.f32 %v1453_v18, %v2274_v17 }
 0x251   : > { %v812_v20 = vpop.f32.mrf.mxu1 }
 0x252   : > { %1288 = vst [vmem:[%s2282_s28] sm:$0xff] %v1287_v13   ;;  %v1332_v8 = vpack.c.bf16 %v821_v5, %v818_v22  ;;  %v813_v49 = vadd.f32 %v2274_v17, %v812_v20 }
 0x254   : > { %1387 = vst [vmem:[%s2282_s28 + $0x48] sm:$0xff] %v1332_v8   ;;  %v1327_v6 = vpack.c.bf16 %v813_v49, %v810_v35 }
 0x256   : > { %1386 = vst [vmem:[%s2282_s28 + $0x40] sm:$0xff] %v1327_v6  }
 0x257   : > { %v1440_v50 = vpop.f32.mrf.mxu0 }
 0x258   : > { %v770_v52 = vadd.f32 %v1440_v50, %v2274_v17 }
 0x259   : > { %v761_v51 = vpop.f32.mrf.mxu0 }
 0x25a   : > { %v762_v59 = vadd.f32 %v2274_v17, %v761_v51 }
 0x25b   : > { %v1441_v21 = vpop.f32.mrf.mxu0  ;;  %v1456_v54 = vpop.f32.mrf.mxu1 }
 0x25c   : > { %v773_v25 = vadd.f32 %v1441_v21, %v2274_v17  ;;  %v834_v7 = vadd.f32 %v1456_v54, %v2274_v17 }
 0x25d   : > { %v764_v23 = vpop.f32.mrf.mxu0  ;;  %v825_v38 = vpop.f32.mrf.mxu1 }
 0x25e   : > { %v1302_v9 = vpack.c.bf16 %v773_v25, %v770_v52  ;;  %v765_v10 = vadd.f32 %v2274_v17, %v764_v23  ;;  %v826_v57 = vadd.f32 %v2274_v17, %v825_v38 }
 0x25f   : > { %v1457_v16 = vpop.f32.mrf.mxu1 }
 0x260   : > { %1381 = vst [vmem:[%s2282_s28 + $0x18] sm:$0xff] %v1302_v9   ;;  %v1297_v24 = vpack.c.bf16 %v765_v10, %v762_v59  ;;  %v837_v55 = vadd.f32 %v1457_v16, %v2274_v17 }
 0x261   : > { %v828_v56 = vpop.f32.mrf.mxu1 }
 0x262   : > { %1380 = vst [vmem:[%s2282_s28 + $0x10] sm:$0xff] %v1297_v24   ;;  %v1342_v26 = vpack.c.bf16 %v837_v55, %v834_v7  ;;  %v829_v41 = vadd.f32 %v2274_v17, %v828_v56 }
 0x264   : > { %1389 = vst [vmem:[%s2282_s28 + $0x58] sm:$0xff] %v1342_v26   ;;  %v1337_v53 = vpack.c.bf16 %v829_v41, %v826_v57 }
 0x266   : > { %1388 = vst [vmem:[%s2282_s28 + $0x50] sm:$0xff] %v1337_v53  }
 0x267   : > { %v1444_v58 = vpop.f32.mrf.mxu0 }
 0x268   : > { %v786_v12 = vadd.f32 %v1444_v58, %v2274_v17 }
 0x269   : > { %v777_v28 = vpop.f32.mrf.mxu0 }
 0x26a   : > { %v778_v62 = vadd.f32 %v2274_v17, %v777_v28 }
 0x26b   : > { %v1445_v27 = vpop.f32.mrf.mxu0  ;;  %v1460_v61 = vpop.f32.mrf.mxu1 }
 0x26c   : > { %v789_v29 = vadd.f32 %v1445_v27, %v2274_v17  ;;  %v850_v30 = vadd.f32 %v1460_v61, %v2274_v17 }
 0x26d   : > { %v780_v60 = vpop.f32.mrf.mxu0  ;;  %v841_v14 = vpop.f32.mrf.mxu1 }
 0x26e   : > { %v1312_v19 = vpack.c.bf16 %v789_v29, %v786_v12  ;;  %v781_v44 = vadd.f32 %v2274_v17, %v780_v60  ;;  %v842_v46 = vadd.f32 %v2274_v17, %v841_v14 }
 0x26f   : > { %v1461_v11 = vpop.f32.mrf.mxu1 }
 0x270   : > { %1383 = vst [vmem:[%s2282_s28 + $0x28] sm:$0xff] %v1312_v19   ;;  %v1307_v63 = vpack.c.bf16 %v781_v44, %v778_v62  ;;  %v853_v32 = vadd.f32 %v1461_v11, %v2274_v17 }
 0x271   : > { %v844_v0 = vpop.f32.mrf.mxu1 }
 0x272   : > { %1382 = vst [vmem:[%s2282_s28 + $0x20] sm:$0xff] %v1307_v63   ;;  %v1352_v2 = vpack.c.bf16 %v853_v32, %v850_v30  ;;  %v845_v34 = vadd.f32 %v2274_v17, %v844_v0 }
 0x274   : > { %1391 = vst [vmem:[%s2282_s28 + $0x68] sm:$0xff] %v1352_v2   ;;  %v1347_v31 = vpack.c.bf16 %v845_v34, %v842_v46 }
 0x276   : > { %1390 = vst [vmem:[%s2282_s28 + $0x60] sm:$0xff] %v1347_v31  }
 0x277   : > { %v1448_v33 = vpop.f32.mrf.mxu0 }
 0x278   : > { %v802_v40 = vadd.f32 %v1448_v33, %v2274_v17 }
 0x279   : > { %v793_v15 = vpop.f32.mrf.mxu0 }
 0x27a   : > { %v794_v48 = vadd.f32 %v2274_v17, %v793_v15 }
 0x27b   : > { %v1449_v37 = vpop.f32.mrf.mxu0  ;;  %v1464_v36 = vpop.f32.mrf.mxu1 }
 0x27c   : > { %v805_v3 = vadd.f32 %v1449_v37, %v2274_v17  ;;  %v866_v47 = vadd.f32 %v1464_v36, %v2274_v17 }
 0x27d   : > { %v796_v39 = vpop.f32.mrf.mxu0  ;;  %v857_v1 = vpop.f32.mrf.mxu1 }
 0x27e   : > { %v1322_v45 = vpack.c.bf16 %v805_v3, %v802_v40  ;;  %v797_v43 = vadd.f32 %v2274_v17, %v796_v39  ;;  %v858_v13 = vadd.f32 %v2274_v17, %v857_v1 }
 0x27f   : > { %v1465_v42 = vpop.f32.mrf.mxu1 }
 0x280   : > { %1385 = vst [vmem:[%s2282_s28 + $0x38] sm:$0xff] %v1322_v45   ;;  %v1317_v4 = vpack.c.bf16 %v797_v43, %v794_v48  ;;  %v869_v18 = vadd.f32 %v1465_v42, %v2274_v17 }
 0x281   : > { %v860_v22 = vpop.f32.mrf.mxu1 }
 0x282   : > { %1384 = vst [vmem:[%s2282_s28 + $0x30] sm:$0xff] %v1317_v4   ;;  %v1362_v5 = vpack.c.bf16 %v869_v18, %v866_v47  ;;  %v861_v20 = vadd.f32 %v2274_v17, %v860_v22 }
 0x284   : > { %1393 = vst [vmem:[%s2282_s28 + $0x78] sm:$0xff] %v1362_v5   ;;  %v1357_v35 = vpack.c.bf16 %v861_v20, %v858_v13 }
 0x286   : > { %1392 = vst [vmem:[%s2282_s28 + $0x70] sm:$0xff] %v1357_v35  }
 0x287   : > { %1682 = shalt.err (!%p1679_p0)
}
 0x288   : > { %s1683_s11 = scalar_lea.hbm %s2331_s4, 2048  ;;  %s1687_s30 = scalar_lea.hbm %s2380_s3, 8192 }
 0x289   : > { %p1684_p5 = scmp.ne.s32.totalorder %s2331_s4, %s1683_s11  ;;  %p1688_p4 = scmp.lt.s32.totalorder %s2331_s4, %s2380_s3 }
 0x28a   : > { %p1689_p6 = scmp.lt.s32.totalorder %s1687_s30, %s1683_s11 }
 0x28b   : > { %p1685_p2 = pnand %p1684_p5, %p2396_p10 }
 0x28c   : > { %p1690_p8 = por %p1689_p6, %p1688_p4 }
 0x28d   : > { %p1686_p1 = pneg %p1685_p2 }
 0x28f   : > { %p1691_p3 = pnand %p1690_p8, %p1686_p1 }
 0x291   : > { %1694 = shalt.err (!%p1691_p3)
}
 0x292   : > { %s1744_s20 = smov 64   ;;  %s1745_s28 = smov 4  }
 0x293   : > { %1488 = dma.vmem_to_hbm [thread:$0]  (%p2396_p10), %s2333_s17, 2048, %s2331_s4, %s1033_s16, %s1744_s20, %s1744_s20, %s1745_s28  }
 0x294 PF: > { %p1505_p7 = scmp.ge.s32.totalorder %s1737_s15, 2  ;;  %s1061_s29 = sand.u32 1, %s1725_s12  }
 0x295   : > { %p2397_p9 = scmp.ne.s32.totalorder %s2386_s19, 0  ;;  %s1062_s22 = scalar_lea.sflag [#allocation4], %s1061_s29 }
 0x297   : > { %p1499_p11 = pnand %p1505_p7, %p2397_p9 }
 0x299   : > { %p1500_p12 = pneg %p1499_p11 }
 0x29b   : > { %1720 = dma.done.wait (%p1500_p12), %s1062_s22, 2048  }
 0x29c   : > { %1722 = vsyncadd (%p1500_p12), %s1062_s22, 4294965248  ;;  %p17_p13 = scmp.ge.s32.totalorder %s1819_s24, 6   ;;  %s2398_s12 = smov %s1729_s13 }
 0x29d   : > { %s2399_s13 = smov %s1733_s14  ;;  %s2400_s14 = smov %s1839_s5 }
 0x29e   : > { %s2401_s15 = smov %s1819_s24  ;;  %19 = sbr.rel (!%p17_p13) target bundleno = 6 (0x6), region = 81 }
 0x2a3   :  { %1067 = vsyncpa [#allocation3], 1 }
 0x2a4   :  { %1069 = vsyncpa [#allocation3 + $0x1], 1 }
 0x2a5   :  { %1070 = vsyncpa [#allocation6], 1 }
 0x2a6   :  { %1071 = vsyncpa [#allocation4], 1 }
 0x2a7   :  { %1073 = vsyncpa [#allocation4 + $0x1], 1 }

</bundles_post_ra>
